<compile_context>
chip_gen: v6e
topology: v6e:2x2x1
jax: 0.10.0
libtpu: 0.0.40
codegen_flags: <defaults>
</compile_context>

<pallas_src>
import math
import functools

import jax
import jax.numpy as jnp
from jax import lax
from jax.experimental import pallas as pl
from jax.experimental.pallas import tpu as pltpu

_VMEM_LIMIT = 48 * 1024 * 1024


def _row_tile(n, target=512):
    """Row tile for row-parallel matmuls (full if small, else 512; tail masked)."""
    return n if n <= target else target


def _seq_tile(n, target=256):
    """Largest multiple-of-8 tile <= target that divides n exactly, else n."""
    if n <= target:
        return n
    t = (target // 8) * 8
    while t >= 8:
        if n % t == 0:
            return t
        t -= 8
    return n


# ----------------------------------------------------------------------------
# Kernel 1: fused QKV projection.
#   acc = x @ W_perm + b   (bf16 MXU inputs, f32 accumulation)
#   q_out  = acc[:, :D]    (Q columns, score scale already folded in)
#   kv_out = acc[:, D:3D]  ([K | V] head-concat columns)
# ----------------------------------------------------------------------------
def _qkv_proj_kernel(x_ref, w_ref, b_ref, q_ref, kv_ref, *, d_model):
    x = x_ref[...].astype(jnp.bfloat16)
    acc = jnp.dot(x, w_ref[...], preferred_element_type=jnp.float32) + b_ref[...]
    q_ref[...] = acc[:, :d_model].astype(q_ref.dtype)
    kv_ref[...] = acc[:, d_model:].astype(kv_ref.dtype)


# ----------------------------------------------------------------------------
# Kernel 3: row-tiled  y = x @ W + b  (output projection).
# ----------------------------------------------------------------------------
def _matmul_bias_kernel(x_ref, w_ref, b_ref, o_ref):
    x = x_ref[...].astype(jnp.bfloat16)
    acc = jnp.dot(x, w_ref[...], preferred_element_type=jnp.float32)
    o_ref[...] = (acc + b_ref[...]).astype(o_ref.dtype)


# ----------------------------------------------------------------------------
# Kernel 2: multi-head attention with softmax over the HEAD axis.
# Grid: (B, S//tq, S//tk).  The k axis accumulates into a VMEM f32 scratch of
# shape (H, tq, hd); the finalize stores it straight into the (B, H, S, hd)
# output (PyTorch's head/seq-scrambled reshape then becomes free).
# ----------------------------------------------------------------------------
def _attn_kernel(q_ref, kv_ref, o_ref, acc_ref, *, num_heads, head_dims, d_model):
    k_idx = pl.program_id(2)

    @pl.when(k_idx == 0)
    def _init():
        acc_ref[...] = jnp.zeros_like(acc_ref)

    q_all = q_ref[0]     # (tq, D)  bf16, Q pre-scaled by 1/sqrt(hd), head-concat
    kv_all = kv_ref[0]   # (tk, 2D) bf16, [K head-concat | V head-concat]

    scores, vals = [], []
    for h in range(num_heads):
        lo = h * head_dims
        hi = lo + head_dims
        q_h = q_all[:, lo:hi]                         # (tq, hd)
        k_h = kv_all[:, lo:hi]                        # (tk, hd)
        v_h = kv_all[:, d_model + lo:d_model + hi]    # (tk, hd)
        # Contract last dims directly; no materialized k.T relayout.
        s_h = lax.dot_general(q_h, k_h, (((1,), (1,)), ((), ())),
                              preferred_element_type=jnp.float32)   # (tq, tk)
        scores.append(s_h)
        vals.append(v_h)

    # Softmax across the HEAD axis (PyTorch implicit dim=1 for a 4-D tensor):
    # per-(q, k) normalization, so every k tile is independent.
    s_all = jnp.stack(scores, axis=0)                 # (H, tq, tk) f32
    m = jnp.max(s_all, axis=0)                        # (tq, tk)
    e_all = jnp.exp(s_all - m[None])                  # (H, tq, tk)
    inv = pl.reciprocal(jnp.sum(e_all, axis=0), approx=True)

    outs = []
    for h in range(num_heads):
        attn = (e_all[h] * inv).astype(jnp.bfloat16)                     # (tq, tk)
        outs.append(jnp.dot(attn, vals[h], preferred_element_type=jnp.float32))
    acc_ref[...] += jnp.stack(outs, axis=0)           # (H, tq, hd)

    @pl.when(k_idx == pl.num_programs(2) - 1)
    def _finalize():
        o_ref[0] = acc_ref[...].astype(o_ref.dtype)   # (H, tq, hd)


# ----------------------------------------------------------------------------
# Wrapper
# ----------------------------------------------------------------------------
@functools.partial(jax.jit, static_argnames=("num_heads",))
def multihead_attention(x, params, *, num_heads):
    """x: (B, S, d_model) f32.  params: (wqkv(D,3D), bqkv(1,3D), wo(D,D), bo(1,D))."""
    B, S, D = x.shape
    hd = D // num_heads
    wqkv, bqkv, wo, bo = params

    # Trace-time weight prep: permute QKV columns from the PyTorch per-head
    # [q|k|v] interleave into [Q_allheads | K_allheads | V_allheads], fold the
    # 1/sqrt(hd) score scale into the Q columns (weights AND bias), cast bf16.
    col = jnp.arange(D)
    base = (col // hd) * (3 * hd) + (col % hd)
    perm = jnp.concatenate([base, base + hd, base + 2 * hd])          # [Q | K | V]
    scale = jnp.concatenate([jnp.full((D,), 1.0 / math.sqrt(hd), jnp.float32),
                             jnp.ones((2 * D,), jnp.float32)])
    wqkv_p = (wqkv[:, perm] * scale[None, :]).astype(jnp.bfloat16)
    bqkv_p = (bqkv[:, perm] * scale[None, :]).astype(jnp.float32)
    wo_b = wo.astype(jnp.bfloat16)
    bo_f = bo.astype(jnp.float32)

    BS = B * S
    tm = _row_tile(BS)

    # ---- Kernel 1: QKV projection -> Q (BS, D) bf16, KV (BS, 2D) bf16.
    q2d, kv2d = pl.pallas_call(
        functools.partial(_qkv_proj_kernel, d_model=D),
        out_shape=(jax.ShapeDtypeStruct((BS, D), jnp.bfloat16),
                   jax.ShapeDtypeStruct((BS, 2 * D), jnp.bfloat16)),
        grid=(pl.cdiv(BS, tm),),
        in_specs=[
            pl.BlockSpec((tm, D), lambda i: (i, 0)),
            pl.BlockSpec((D, 3 * D), lambda i: (0, 0)),
            pl.BlockSpec((1, 3 * D), lambda i: (0, 0)),
        ],
        out_specs=(pl.BlockSpec((tm, D), lambda i: (i, 0)),
                   pl.BlockSpec((tm, 2 * D), lambda i: (i, 0))),
        compiler_params=pltpu.CompilerParams(
            dimension_semantics=("parallel",),
            vmem_limit_bytes=_VMEM_LIMIT),
    )(x.reshape(BS, D), wqkv_p, bqkv_p)
    q3 = q2d.reshape(B, S, D)
    kv3 = kv2d.reshape(B, S, 2 * D)

    # ---- Kernel 2: attention (softmax over heads).  Output layout (B, H, S, hd)
    # so the PyTorch scramble below is a free contiguous reshape.
    tq = _seq_tile(S)
    tk = _seq_tile(S)
    attn_out = pl.pallas_call(
        functools.partial(_attn_kernel, num_heads=num_heads, head_dims=hd, d_model=D),
        out_shape=jax.ShapeDtypeStruct((B, num_heads, S, hd), jnp.bfloat16),
        grid=(B, S // tq, S // tk),
        in_specs=[
            pl.BlockSpec((1, tq, D), lambda b, qi, ki: (b, qi, 0)),       # Q
            pl.BlockSpec((1, tk, 2 * D), lambda b, qi, ki: (b, ki, 0)),   # K,V
        ],
        out_specs=pl.BlockSpec((1, num_heads, tq, hd),
                               lambda b, qi, ki: (b, 0, qi, 0)),
        scratch_shapes=[pltpu.VMEM((num_heads, tq, hd), jnp.float32)],
        compiler_params=pltpu.CompilerParams(
            dimension_semantics=("parallel", "parallel", "arbitrary"),
            vmem_limit_bytes=_VMEM_LIMIT),
    )(q3, kv3)

    # Exact PyTorch semantics: values = (B, H, S, hd).reshape(B, S, H*hd) with NO
    # head transpose back (row-major scramble).  Because the kernel already wrote
    # (B, H, S, hd), this reshape is contiguous and free.
    values = attn_out.reshape(BS, D)

    # ---- Kernel 3: output projection, row-tiled:  (BS, D) @ (D, D) + b.
    out2d = pl.pallas_call(
        _matmul_bias_kernel,
        out_shape=jax.ShapeDtypeStruct((BS, D), jnp.float32),
        grid=(pl.cdiv(BS, tm),),
        in_specs=[
            pl.BlockSpec((tm, D), lambda i: (i, 0)),
            pl.BlockSpec((D, D), lambda i: (0, 0)),
            pl.BlockSpec((1, D), lambda i: (0, 0)),
        ],
        out_specs=pl.BlockSpec((tm, D), lambda i: (i, 0)),
        compiler_params=pltpu.CompilerParams(
            dimension_semantics=("parallel",),
            vmem_limit_bytes=_VMEM_LIMIT),
    )(values, wo_b, bo_f)

    return out2d.reshape(B, S, D)


# ----------------------------------------------------------------------------
# Pure-JAX reference (mirrors PyTorch semantics) for a sanity check
# ----------------------------------------------------------------------------
def _reference(x, params, *, num_heads):
    B, S, D = x.shape
    hd = D // num_heads
    wqkv, bqkv, wo, bo = params
    qkv = x @ wqkv + bqkv                              # (B, S, 3D)
    qkv = qkv.reshape(B, S, num_heads, 3 * hd).transpose(0, 2, 1, 3)
    q, k, v = jnp.split(qkv, 3, axis=-1)               # (B, H, S, hd) each
    scaled = jnp.einsum("bhqd,bhkd->bhqk", q, k) / math.sqrt(hd)
    attn = jax.nn.softmax(scaled, axis=1)              # softmax over heads (dim=1)
    out = jnp.einsum("bhqk,bhkd->bhqd", attn, v)       # (B, H, S, hd)
    values = out.reshape(B, S, num_heads * hd)         # no transpose back
    return values @ wo + bo


def _init_params(key, d_model):
    k1, k2, k3, k4 = jax.random.split(key, 4)
    lim = 1.0 / math.sqrt(d_model)
    wqkv = jax.random.uniform(k1, (d_model, 3 * d_model), jnp.float32, -lim, lim)
    bqkv = jax.random.uniform(k2, (1, 3 * d_model), jnp.float32, -lim, lim)
    wo = jax.random.uniform(k3, (d_model, d_model), jnp.float32, -lim, lim)
    bo = jax.random.uniform(k4, (1, d_model), jnp.float32, -lim, lim)
    return wqkv, bqkv, wo, bo


if __name__ == "__main__":
    B, S, d_model, num_heads = 2, 8, 32, 4

    key = jax.random.PRNGKey(0)
    kx, kp = jax.random.split(key)
    x = jax.random.normal(kx, (B, S, d_model), jnp.float32)
    params = _init_params(kp, d_model)

    out = multihead_attention(x, params, num_heads=num_heads)
    out = jax.block_until_ready(out)

    ref = _reference(x, params, num_heads=num_heads)
    assert out.shape == (B, S, d_model)
    assert jnp.allclose(out, ref, rtol=2e-2, atol=2e-2), "mismatch vs reference"

    print("KERNEL_OK")
</pallas_src>

<mosaic_0001>
module attributes {stable_mosaic.version = 11 : i64} {
  func.func @_attn_kernel(%arg0: i32, %arg1: i32, %arg2: i32, %arg3: memref<1x8x32xbf16, #tpu.memory_space<vmem>>, %arg4: memref<1x8x64xbf16, #tpu.memory_space<vmem>>, %arg5: memref<1x4x8x8xbf16, #tpu.memory_space<vmem>>, %arg6: memref<4x8x8xf32, #tpu.memory_space<vmem>>) attributes {dimension_semantics = [#tpu.dimension_semantics<parallel>, #tpu.dimension_semantics<parallel>, #tpu.dimension_semantics<arbitrary>], iteration_bounds = array<i64: 2, 1, 1>, scalar_prefetch = 0 : i64, scratch_operands = 1 : i64, tpu.core_type = #tpu.core_type<tc>, window_params = [{transform_indices = @transform_0, window_bounds = array<i64: 1, 8, 32>}, {transform_indices = @transform_1, window_bounds = array<i64: 1, 8, 64>}, {transform_indices = @transform_2, window_bounds = array<i64: 1, 4, 8, 8>}]} {
    %c0_i32 = arith.constant 0 : i32
    %0 = arith.cmpi eq, %arg2, %c0_i32 : i32
    %1 = arith.extui %0 : i1 to i32
    %c0_i32_0 = arith.constant 0 : i32
    %2 = arith.cmpi ne, %1, %c0_i32_0 : i32
    scf.if %2 {
      %cst_23 = arith.constant 0.000000e+00 : f32
      %66 = vector.broadcast %cst_23 : f32 to vector<4x8x8xf32>
      %c0_24 = arith.constant 0 : index
      %c0_25 = arith.constant 0 : index
      %c0_26 = arith.constant 0 : index
      %67 = vector.load %arg6[%c0_24, %c0_25, %c0_26] : memref<4x8x8xf32, #tpu.memory_space<vmem>>, vector<4x8x8xf32>
      tpu.vector_store %arg6[%c0_24, %c0_25, %c0_26], %66 {strides = array<i32>} : memref<4x8x8xf32, #tpu.memory_space<vmem>>, vector<4x8x8xf32>,
    } else {
    }
    %c0 = arith.constant 0 : index
    %c0_1 = arith.constant 0 : index
    %c0_2 = arith.constant 0 : index
    %3 = vector.load %arg3[%c0, %c0_1, %c0_2] : memref<1x8x32xbf16, #tpu.memory_space<vmem>>, vector<1x8x32xbf16>
    %4 = vector.shape_cast %3 : vector<1x8x32xbf16> to vector<8x32xbf16>
    %c0_3 = arith.constant 0 : index
    %c0_4 = arith.constant 0 : index
    %c0_5 = arith.constant 0 : index
    %5 = vector.load %arg4[%c0_3, %c0_4, %c0_5] : memref<1x8x64xbf16, #tpu.memory_space<vmem>>, vector<1x8x64xbf16>
    %6 = vector.shape_cast %5 : vector<1x8x64xbf16> to vector<8x64xbf16>
    %7 = vector.extract_strided_slice %4 {offsets = [0, 0], sizes = [8, 8], strides = [1, 1]} : vector<8x32xbf16> to vector<8x8xbf16>
    %8 = vector.extract_strided_slice %6 {offsets = [0, 0], sizes = [8, 8], strides = [1, 1]} : vector<8x64xbf16> to vector<8x8xbf16>
    %9 = vector.extract_strided_slice %6 {offsets = [0, 32], sizes = [8, 8], strides = [1, 1]} : vector<8x64xbf16> to vector<8x8xbf16>
    %cst = arith.constant dense<0.000000e+00> : vector<8x8xf32>
    %10 = tpu.matmul %7, %8, %cst {dimension_numbers = #tpu.dot_dimension_numbers<[1], [1], [0], [0], [0, 0, 1, 0], [], []>} : vector<8x8xbf16>, vector<8x8xbf16>, vector<8x8xf32> -> vector<8x8xf32>
    %11 = vector.extract_strided_slice %4 {offsets = [0, 8], sizes = [8, 8], strides = [1, 1]} : vector<8x32xbf16> to vector<8x8xbf16>
    %12 = vector.extract_strided_slice %6 {offsets = [0, 8], sizes = [8, 8], strides = [1, 1]} : vector<8x64xbf16> to vector<8x8xbf16>
    %13 = vector.extract_strided_slice %6 {offsets = [0, 40], sizes = [8, 8], strides = [1, 1]} : vector<8x64xbf16> to vector<8x8xbf16>
    %cst_6 = arith.constant dense<0.000000e+00> : vector<8x8xf32>
    %14 = tpu.matmul %11, %12, %cst_6 {dimension_numbers = #tpu.dot_dimension_numbers<[1], [1], [0], [0], [0, 0, 1, 0], [], []>} : vector<8x8xbf16>, vector<8x8xbf16>, vector<8x8xf32> -> vector<8x8xf32>
    %15 = vector.extract_strided_slice %4 {offsets = [0, 16], sizes = [8, 8], strides = [1, 1]} : vector<8x32xbf16> to vector<8x8xbf16>
    %16 = vector.extract_strided_slice %6 {offsets = [0, 16], sizes = [8, 8], strides = [1, 1]} : vector<8x64xbf16> to vector<8x8xbf16>
    %17 = vector.extract_strided_slice %6 {offsets = [0, 48], sizes = [8, 8], strides = [1, 1]} : vector<8x64xbf16> to vector<8x8xbf16>
    %cst_7 = arith.constant dense<0.000000e+00> : vector<8x8xf32>
    %18 = tpu.matmul %15, %16, %cst_7 {dimension_numbers = #tpu.dot_dimension_numbers<[1], [1], [0], [0], [0, 0, 1, 0], [], []>} : vector<8x8xbf16>, vector<8x8xbf16>, vector<8x8xf32> -> vector<8x8xf32>
    %19 = vector.extract_strided_slice %4 {offsets = [0, 24], sizes = [8, 8], strides = [1, 1]} : vector<8x32xbf16> to vector<8x8xbf16>
    %20 = vector.extract_strided_slice %6 {offsets = [0, 24], sizes = [8, 8], strides = [1, 1]} : vector<8x64xbf16> to vector<8x8xbf16>
    %21 = vector.extract_strided_slice %6 {offsets = [0, 56], sizes = [8, 8], strides = [1, 1]} : vector<8x64xbf16> to vector<8x8xbf16>
    %cst_8 = arith.constant dense<0.000000e+00> : vector<8x8xf32>
    %22 = tpu.matmul %19, %20, %cst_8 {dimension_numbers = #tpu.dot_dimension_numbers<[1], [1], [0], [0], [0, 0, 1, 0], [], []>} : vector<8x8xbf16>, vector<8x8xbf16>, vector<8x8xf32> -> vector<8x8xf32>
    %23 = vector.shape_cast %10 : vector<8x8xf32> to vector<1x8x8xf32>
    %24 = vector.shape_cast %14 : vector<8x8xf32> to vector<1x8x8xf32>
    %25 = vector.shape_cast %18 : vector<8x8xf32> to vector<1x8x8xf32>
    %26 = vector.shape_cast %22 : vector<8x8xf32> to vector<1x8x8xf32>
    %27 = tpu.concatenate %23, %24, %25, %26 in 0 : vector<1x8x8xf32>, vector<1x8x8xf32>, vector<1x8x8xf32>, vector<1x8x8xf32> -> vector<4x8x8xf32>
    %cst_9 = arith.constant dense<0xFF800000> : vector<8x8xf32>
    %28 = vector.multi_reduction <maximumf>, %27, %cst_9 [0] : vector<4x8x8xf32> to vector<8x8xf32>
    %29 = vector.shape_cast %28 : vector<8x8xf32> to vector<1x8x8xf32>
    %30 = vector.broadcast %29 : vector<1x8x8xf32> to vector<4x8x8xf32>
    %31 = arith.subf %27, %30 : vector<4x8x8xf32>
    %32 = math.exp %31 : vector<4x8x8xf32>
    %cst_10 = arith.constant dense<0.000000e+00> : vector<8x8xf32>
    %33 = vector.multi_reduction <add>, %32, %cst_10 [0] : vector<4x8x8xf32> to vector<8x8xf32>
    %34 = tpu.reciprocal %33 {approx = true} : vector<8x8xf32> -> vector<8x8xf32>
    %35 = vector.extract_strided_slice %32 {offsets = [0, 0, 0], sizes = [1, 8, 8], strides = [1, 1, 1]} : vector<4x8x8xf32> to vector<1x8x8xf32>
    %36 = vector.shape_cast %35 : vector<1x8x8xf32> to vector<8x8xf32>
    %37 = arith.mulf %36, %34 : vector<8x8xf32>
    %38 = arith.truncf %37 : vector<8x8xf32> to vector<8x8xbf16>
    %cst_11 = arith.constant dense<0.000000e+00> : vector<8x8xf32>
    %39 = tpu.matmul %38, %9, %cst_11 {dimension_numbers = #tpu.dot_dimension_numbers<[1], [0], [0], [1], [0, 0, 1, 1], [], []>} : vector<8x8xbf16>, vector<8x8xbf16>, vector<8x8xf32> -> vector<8x8xf32>
    %40 = vector.extract_strided_slice %32 {offsets = [1, 0, 0], sizes = [1, 8, 8], strides = [1, 1, 1]} : vector<4x8x8xf32> to vector<1x8x8xf32>
    %41 = vector.shape_cast %40 : vector<1x8x8xf32> to vector<8x8xf32>
    %42 = arith.mulf %41, %34 : vector<8x8xf32>
    %43 = arith.truncf %42 : vector<8x8xf32> to vector<8x8xbf16>
    %cst_12 = arith.constant dense<0.000000e+00> : vector<8x8xf32>
    %44 = tpu.matmul %43, %13, %cst_12 {dimension_numbers = #tpu.dot_dimension_numbers<[1], [0], [0], [1], [0, 0, 1, 1], [], []>} : vector<8x8xbf16>, vector<8x8xbf16>, vector<8x8xf32> -> vector<8x8xf32>
    %45 = vector.extract_strided_slice %32 {offsets = [2, 0, 0], sizes = [1, 8, 8], strides = [1, 1, 1]} : vector<4x8x8xf32> to vector<1x8x8xf32>
    %46 = vector.shape_cast %45 : vector<1x8x8xf32> to vector<8x8xf32>
    %47 = arith.mulf %46, %34 : vector<8x8xf32>
    %48 = arith.truncf %47 : vector<8x8xf32> to vector<8x8xbf16>
    %cst_13 = arith.constant dense<0.000000e+00> : vector<8x8xf32>
    %49 = tpu.matmul %48, %17, %cst_13 {dimension_numbers = #tpu.dot_dimension_numbers<[1], [0], [0], [1], [0, 0, 1, 1], [], []>} : vector<8x8xbf16>, vector<8x8xbf16>, vector<8x8xf32> -> vector<8x8xf32>
    %50 = vector.extract_strided_slice %32 {offsets = [3, 0, 0], sizes = [1, 8, 8], strides = [1, 1, 1]} : vector<4x8x8xf32> to vector<1x8x8xf32>
    %51 = vector.shape_cast %50 : vector<1x8x8xf32> to vector<8x8xf32>
    %52 = arith.mulf %51, %34 : vector<8x8xf32>
    %53 = arith.truncf %52 : vector<8x8xf32> to vector<8x8xbf16>
    %cst_14 = arith.constant dense<0.000000e+00> : vector<8x8xf32>
    %54 = tpu.matmul %53, %21, %cst_14 {dimension_numbers = #tpu.dot_dimension_numbers<[1], [0], [0], [1], [0, 0, 1, 1], [], []>} : vector<8x8xbf16>, vector<8x8xbf16>, vector<8x8xf32> -> vector<8x8xf32>
    %c0_15 = arith.constant 0 : index
    %c0_16 = arith.constant 0 : index
    %c0_17 = arith.constant 0 : index
    %55 = vector.load %arg6[%c0_15, %c0_16, %c0_17] : memref<4x8x8xf32, #tpu.memory_space<vmem>>, vector<4x8x8xf32>
    %56 = vector.shape_cast %39 : vector<8x8xf32> to vector<1x8x8xf32>
    %57 = vector.shape_cast %44 : vector<8x8xf32> to vector<1x8x8xf32>
    %58 = vector.shape_cast %49 : vector<8x8xf32> to vector<1x8x8xf32>
    %59 = vector.shape_cast %54 : vector<8x8xf32> to vector<1x8x8xf32>
    %60 = tpu.concatenate %56, %57, %58, %59 in 0 : vector<1x8x8xf32>, vector<1x8x8xf32>, vector<1x8x8xf32>, vector<1x8x8xf32> -> vector<4x8x8xf32>
    %61 = arith.addf %55, %60 : vector<4x8x8xf32>
    %c0_18 = arith.constant 0 : index
    %c0_19 = arith.constant 0 : index
    %c0_20 = arith.constant 0 : index
    %62 = vector.load %arg6[%c0_18, %c0_19, %c0_20] : memref<4x8x8xf32, #tpu.memory_space<vmem>>, vector<4x8x8xf32>
    tpu.vector_store %arg6[%c0_18, %c0_19, %c0_20], %61 {strides = array<i32>} : memref<4x8x8xf32, #tpu.memory_space<vmem>>, vector<4x8x8xf32>,
    %c0_i32_21 = arith.constant 0 : i32
    %63 = arith.cmpi eq, %arg2, %c0_i32_21 : i32
    %64 = arith.extui %63 : i1 to i32
    %c0_i32_22 = arith.constant 0 : i32
    %65 = arith.cmpi ne, %64, %c0_i32_22 : i32
    scf.if %65 {
      %c0_23 = arith.constant 0 : index
      %c0_24 = arith.constant 0 : index
      %c0_25 = arith.constant 0 : index
      %66 = vector.load %arg6[%c0_23, %c0_24, %c0_25] : memref<4x8x8xf32, #tpu.memory_space<vmem>>, vector<4x8x8xf32>
      %67 = arith.truncf %66 : vector<4x8x8xf32> to vector<4x8x8xbf16>
      %c0_26 = arith.constant 0 : index
      %c0_27 = arith.constant 0 : index
      %c0_28 = arith.constant 0 : index
      %c0_29 = arith.constant 0 : index
      %68 = vector.load %arg5[%c0_26, %c0_27, %c0_28, %c0_29] : memref<1x4x8x8xbf16, #tpu.memory_space<vmem>>, vector<1x4x8x8xbf16>
      %69 = vector.shape_cast %68 : vector<1x4x8x8xbf16> to vector<4x8x8xbf16>
      %70 = vector.shape_cast %67 : vector<4x8x8xbf16> to vector<1x4x8x8xbf16>
      tpu.vector_store %arg5[%c0_26, %c0_27, %c0_28, %c0_29], %70 {strides = array<i32>} : memref<1x4x8x8xbf16, #tpu.memory_space<vmem>>, vector<1x4x8x8xbf16>,
    } else {
    }
    return
  }
  func.func @transform_0(%arg0: i32, %arg1: i32, %arg2: i32) -> (i32, i32, i32) {
    %c0_i32 = arith.constant 0 : i32
    %c0_i32_0 = arith.constant 0 : i32
    return %arg0, %arg1, %c0_i32 : i32, i32, i32
  }
  func.func @transform_1(%arg0: i32, %arg1: i32, %arg2: i32) -> (i32, i32, i32) {
    %c0_i32 = arith.constant 0 : i32
    %c0_i32_0 = arith.constant 0 : i32
    return %arg0, %arg2, %c0_i32 : i32, i32, i32
  }
  func.func @transform_2(%arg0: i32, %arg1: i32, %arg2: i32) -> (i32, i32, i32, i32) {
    %c0_i32 = arith.constant 0 : i32
    %c0_i32_0 = arith.constant 0 : i32
    %c0_i32_1 = arith.constant 0 : i32
    return %arg0, %c0_i32, %arg1, %c0_i32_0 : i32, i32, i32, i32
  }
}

module attributes {stable_mosaic.version = 11 : i64} {
  func.func @_qkv_proj_kernel(%arg0: i32, %arg1: memref<16x32xf32, #tpu.memory_space<vmem>>, %arg2: memref<32x96xbf16, #tpu.memory_space<vmem>>, %arg3: memref<1x96xf32, #tpu.memory_space<vmem>>, %arg4: memref<16x32xbf16, #tpu.memory_space<vmem>>, %arg5: memref<16x64xbf16, #tpu.memory_space<vmem>>) attributes {dimension_semantics = [#tpu.dimension_semantics<parallel>], iteration_bounds = array<i64: 1>, scalar_prefetch = 0 : i64, scratch_operands = 0 : i64, tpu.core_type = #tpu.core_type<tc>, window_params = [{transform_indices = @transform_0, window_bounds = array<i64: 16, 32>}, {pipeline_mode = #tpu.pipeline_mode<synchronous>, transform_indices = @transform_1, window_bounds = array<i64: 32, 96>}, {pipeline_mode = #tpu.pipeline_mode<synchronous>, transform_indices = @transform_2, window_bounds = array<i64: 1, 96>}, {transform_indices = @transform_3, window_bounds = array<i64: 16, 32>}, {transform_indices = @transform_4, window_bounds = array<i64: 16, 64>}]} {
    %c0 = arith.constant 0 : index
    %c0_0 = arith.constant 0 : index
    %0 = vector.load %arg1[%c0, %c0_0] : memref<16x32xf32, #tpu.memory_space<vmem>>, vector<16x32xf32>
    %1 = arith.truncf %0 : vector<16x32xf32> to vector<16x32xbf16>
    %c0_1 = arith.constant 0 : index
    %c0_2 = arith.constant 0 : index
    %2 = vector.load %arg2[%c0_1, %c0_2] : memref<32x96xbf16, #tpu.memory_space<vmem>>, vector<32x96xbf16>
    %cst = arith.constant dense<0.000000e+00> : vector<16x96xf32>
    %3 = tpu.matmul %1, %2, %cst {dimension_numbers = #tpu.dot_dimension_numbers<[1], [0], [0], [1], [0, 0, 1, 1], [], []>} : vector<16x32xbf16>, vector<32x96xbf16>, vector<16x96xf32> -> vector<16x96xf32>
    %c0_3 = arith.constant 0 : index
    %c0_4 = arith.constant 0 : index
    %4 = vector.load %arg3[%c0_3, %c0_4] : memref<1x96xf32, #tpu.memory_space<vmem>>, vector<1x96xf32>
    %5 = vector.broadcast %4 : vector<1x96xf32> to vector<16x96xf32>
    %6 = arith.addf %3, %5 : vector<16x96xf32>
    %7 = vector.extract_strided_slice %6 {offsets = [0, 0], sizes = [16, 32], strides = [1, 1]} : vector<16x96xf32> to vector<16x32xf32>
    %8 = arith.truncf %7 : vector<16x32xf32> to vector<16x32xbf16>
    %c0_5 = arith.constant 0 : index
    %c0_6 = arith.constant 0 : index
    %9 = vector.load %arg4[%c0_5, %c0_6] : memref<16x32xbf16, #tpu.memory_space<vmem>>, vector<16x32xbf16>
    tpu.vector_store %arg4[%c0_5, %c0_6], %8 {strides = array<i32>} : memref<16x32xbf16, #tpu.memory_space<vmem>>, vector<16x32xbf16>,
    %10 = vector.extract_strided_slice %6 {offsets = [0, 32], sizes = [16, 64], strides = [1, 1]} : vector<16x96xf32> to vector<16x64xf32>
    %11 = arith.truncf %10 : vector<16x64xf32> to vector<16x64xbf16>
    %c0_7 = arith.constant 0 : index
    %c0_8 = arith.constant 0 : index
    %12 = vector.load %arg5[%c0_7, %c0_8] : memref<16x64xbf16, #tpu.memory_space<vmem>>, vector<16x64xbf16>
    tpu.vector_store %arg5[%c0_7, %c0_8], %11 {strides = array<i32>} : memref<16x64xbf16, #tpu.memory_space<vmem>>, vector<16x64xbf16>,
    return
  }
  func.func @transform_0(%arg0: i32) -> (i32, i32) {
    %c0_i32 = arith.constant 0 : i32
    %c0_i32_0 = arith.constant 0 : i32
    return %arg0, %c0_i32 : i32, i32
  }
  func.func @transform_1(%arg0: i32) -> (i32, i32) {
    %c0_i32 = arith.constant 0 : i32
    %c0_i32_0 = arith.constant 0 : i32
    %c0_i32_1 = arith.constant 0 : i32
    return %c0_i32, %c0_i32_0 : i32, i32
  }
  func.func @transform_2(%arg0: i32) -> (i32, i32) {
    %c0_i32 = arith.constant 0 : i32
    %c0_i32_0 = arith.constant 0 : i32
    %c0_i32_1 = arith.constant 0 : i32
    return %c0_i32, %c0_i32_0 : i32, i32
  }
  func.func @transform_3(%arg0: i32) -> (i32, i32) {
    %c0_i32 = arith.constant 0 : i32
    %c0_i32_0 = arith.constant 0 : i32
    return %arg0, %c0_i32 : i32, i32
  }
  func.func @transform_4(%arg0: i32) -> (i32, i32) {
    %c0_i32 = arith.constant 0 : i32
    %c0_i32_0 = arith.constant 0 : i32
    return %arg0, %c0_i32 : i32, i32
  }
}

module attributes {stable_mosaic.version = 11 : i64} {
  func.func @_matmul_bias_kernel(%arg0: i32, %arg1: memref<16x32xbf16, #tpu.memory_space<vmem>>, %arg2: memref<32x32xbf16, #tpu.memory_space<vmem>>, %arg3: memref<1x32xf32, #tpu.memory_space<vmem>>, %arg4: memref<16x32xf32, #tpu.memory_space<vmem>>) attributes {dimension_semantics = [#tpu.dimension_semantics<parallel>], iteration_bounds = array<i64: 1>, scalar_prefetch = 0 : i64, scratch_operands = 0 : i64, tpu.core_type = #tpu.core_type<tc>, window_params = [{transform_indices = @transform_0, window_bounds = array<i64: 16, 32>}, {pipeline_mode = #tpu.pipeline_mode<synchronous>, transform_indices = @transform_1, window_bounds = array<i64: 32, 32>}, {pipeline_mode = #tpu.pipeline_mode<synchronous>, transform_indices = @transform_2, window_bounds = array<i64: 1, 32>}, {transform_indices = @transform_3, window_bounds = array<i64: 16, 32>}]} {
    %c0 = arith.constant 0 : index
    %c0_0 = arith.constant 0 : index
    %0 = vector.load %arg1[%c0, %c0_0] : memref<16x32xbf16, #tpu.memory_space<vmem>>, vector<16x32xbf16>
    %c0_1 = arith.constant 0 : index
    %c0_2 = arith.constant 0 : index
    %1 = vector.load %arg2[%c0_1, %c0_2] : memref<32x32xbf16, #tpu.memory_space<vmem>>, vector<32x32xbf16>
    %cst = arith.constant dense<0.000000e+00> : vector<16x32xf32>
    %2 = tpu.matmul %0, %1, %cst {dimension_numbers = #tpu.dot_dimension_numbers<[1], [0], [0], [1], [0, 0, 1, 1], [], []>} : vector<16x32xbf16>, vector<32x32xbf16>, vector<16x32xf32> -> vector<16x32xf32>
    %c0_3 = arith.constant 0 : index
    %c0_4 = arith.constant 0 : index
    %3 = vector.load %arg3[%c0_3, %c0_4] : memref<1x32xf32, #tpu.memory_space<vmem>>, vector<1x32xf32>
    %4 = vector.broadcast %3 : vector<1x32xf32> to vector<16x32xf32>
    %5 = arith.addf %2, %4 : vector<16x32xf32>
    %c0_5 = arith.constant 0 : index
    %c0_6 = arith.constant 0 : index
    %6 = vector.load %arg4[%c0_5, %c0_6] : memref<16x32xf32, #tpu.memory_space<vmem>>, vector<16x32xf32>
    tpu.vector_store %arg4[%c0_5, %c0_6], %5 {strides = array<i32>} : memref<16x32xf32, #tpu.memory_space<vmem>>, vector<16x32xf32>,
    return
  }
  func.func @transform_0(%arg0: i32) -> (i32, i32) {
    %c0_i32 = arith.constant 0 : i32
    %c0_i32_0 = arith.constant 0 : i32
    return %arg0, %c0_i32 : i32, i32
  }
  func.func @transform_1(%arg0: i32) -> (i32, i32) {
    %c0_i32 = arith.constant 0 : i32
    %c0_i32_0 = arith.constant 0 : i32
    %c0_i32_1 = arith.constant 0 : i32
    return %c0_i32, %c0_i32_0 : i32, i32
  }
  func.func @transform_2(%arg0: i32) -> (i32, i32) {
    %c0_i32 = arith.constant 0 : i32
    %c0_i32_0 = arith.constant 0 : i32
    %c0_i32_1 = arith.constant 0 : i32
    return %c0_i32, %c0_i32_0 : i32, i32
  }
  func.func @transform_3(%arg0: i32) -> (i32, i32) {
    %c0_i32 = arith.constant 0 : i32
    %c0_i32_0 = arith.constant 0 : i32
    return %arg0, %c0_i32 : i32, i32
  }
}

</mosaic_0001>

<bundles_post_ra>
// kernel: multihead_attention.5
= control target key start
LH: loop header
LB: loop body
LE: loop exit
PB: predicated region body
PF: predicated region fallthrough
CT: control target
= control target key end

     0   :  { %v155_v1 = vmov 0.0   ;;  %vm156_vm0 = vmmov 0   ;;  %s195_s0 = inlined_call_operand.vmem [shape: bf16[16,32], index: 0, kind: input, shape index: {}]   ;;  %s196_s1 = inlined_call_operand.vmem [shape: bf16[32,32], index: 1, kind: input, shape index: {}]   ;;  %s197_s2 = inlined_call_operand.vmem [shape: f32[1,32], index: 2, kind: input, shape index: {}]   ;;  %s198_s3 = inlined_call_operand.hbm [shape: f32[16,32], index: 3, kind: output, shape index: {}]  }
   0x1   :  { %v130_v0 = vld [vmem:[%s196_s1 + $0x8] sm:$0xff]   ;;  %117 = vmatprep.subr.bf16.mxu0 %v155_v1  ;;  %v131_v2 = vld [vmem:[%s196_s1] sm:$0xff]   ;;  %121 = vmatprep.mubr.msk.bf16.mxu0 %vm156_vm0, %v155_v1 }
   0x2   :  { %118 = vmatpush3.bf16.msra.mxu0 %v130_v0 }
   0x3   :  { %119 = vmatprep.subr.bf16.mxu0 %v155_v1 }
   0x4   :  { %8 = vsyncpa [#allocation3], 0  ;;  %v132_v3 = vld [vmem:[%s195_s0] sm:$0xff]   ;;  %vm46_vm1 = vcmask 261120   ;;  %s157_s20 = smov [#allocation2]  }
   0x5   :  { %v109_v4 = vld [vmem:[%s197_s2] ss:$0 sm:$0xff]  ;;  %s98_s21 = sshll.u32 %s157_s20, 4  ;;  %s99_s21 = int_to_ptr.vmem [resolvable:$true] %s98_s21 }
   0x6   :  { %120 = vmatpush3.bf16.msra.mxu0 %v131_v2  ;;  %s133_s1 = scalar_lea.vmem %s99_s21, 256  ;;  %p138_p1 = scmp.lt.s32.totalorder %s99_s21, %s99_s21 }
   0x7   :  { %p134_p0 = scmp.ne.s32.totalorder %s99_s21, %s133_s1  ;;  %p139_p2 = scmp.lt.s32.totalorder %s133_s1, %s133_s1 }
   0x9   :  { %122 = vmatmul.mubr.msk.bf16.vlgmr.msra.gmra.mxu0 %vm46_vm1, %v132_v3  ;;  %p140_p3 = por %p139_p2, %p138_p1 }
   0xb   :  { %p141_p4 = pnand %p140_p3, %p134_p0 }
  0xc9   :  { %v84_v5 = vpop.f32.mrf.mxu0 }
  0xca   :  { %v85_v6 = vadd.f32 %v109_v4, %v84_v5 }
  0xcb   :  { %v123_v7 = vpop.f32.mrf.mxu0 }
  0xcc   :  { %91 = vst.msk [vmem:[#allocation2] sm:$0xff] %vm46_vm1, %v85_v6 }
  0xcd   :  { %v87_v8 = vpop.f32.mrf.mxu0 }
  0xce   :  { %v88_v9 = vadd.f32 %v109_v4, %v87_v8 }
  0xcf   :  { %v124_v10 = vpop.f32.mrf.mxu0 }
  0xd0   :  { %92 = vst.msk [vmem:[#allocation2 + $0x8] sm:$0xff] %vm46_vm1, %v88_v9 }
  0xd1   :  { %144 = shalt.err (!%p141_p4)
}
  0xd2   :  { %s158_s0 = smov 128   ;;  %s159_s2 = smov 8  }
  0xd3   :  { %104 = dma.vmem_to_hbm [thread:$0]  %s99_s21, 256, %s198_s3, [#allocation3], %s158_s0, %s158_s0, %s159_s2  }
  0xd4   :  { %153 = dma.done.wait [#allocation3], 256  }
  0xd5   :  { %154 = vsyncadd [#allocation3], 4294967040 }
  0xd6   :  { %108 = vsyncpa [#allocation3], 1 }

// kernel: multihead_attention.3
= control target key start
LH: loop header
LB: loop body
LE: loop exit
PB: predicated region body
PF: predicated region fallthrough
CT: control target
= control target key end

     0   :  { %v140_v0 = vmov 0.0   ;;  %vm141_vm0 = vmmov 0   ;;  %vm43_vm1 = vcmask 261120   ;;  %vm96_vm2 = vcmask 257024   ;;  %s195_s1 = inlined_call_operand.vmem [shape: bf16[32,96], index: 1, kind: input, shape index: {}]   ;;  %s196_s0 = inlined_call_operand.vmem [shape: f32[16,32], index: 0, kind: input, shape index: {}]   ;;  %s197_s2 = inlined_call_operand.vmem [shape: f32[1,96], index: 2, kind: input, shape index: {}]   ;;  %s198_s3 = inlined_call_operand.vmem [shape: bf16[16,32], index: 3, kind: output, shape index: {0}]   ;;  %s199_s4 = inlined_call_operand.vmem [shape: bf16[16,64], index: 4, kind: output, shape index: {1}]  }
   0x1   :  { %127 = vmatprep.subr.bf16.mxu0 %v140_v0  ;;  %v138_v1 = vld [vmem:[%s195_s1 + $0x8] sm:$0xff]   ;;  %131 = vmatprep.mubr.msk.bf16.mxu0 %vm141_vm0, %v140_v0  ;;  %v139_v2 = vld [vmem:[%s195_s1] sm:$0xff]   ;;  %vm105_vm3 = vcmask 519168  }
   0x2   :  { %128 = vmatpush3.bf16.msra.mxu0 %v138_v1  ;;  %v17_v3 = vld [vmem:[%s196_s0] sm:$0xff]  ;;  %v18_v4 = vld [vmem:[%s196_s0 + $0x8] sm:$0xff]  ;;  %s142_s0 = smov 96  }
   0x3   :  { %129 = vmatprep.subr.bf16.mxu0 %v140_v0  ;;  %v19_v5 = vpack.c.bf16 %v18_v4, %v17_v3  ;;  %v116_v6 = vld [vmem:[%s197_s2] ss:$0 sm:$0xff] }
   0x6   :  { %130 = vmatpush3.bf16.msra.mxu0 %v139_v2 }
   0x9   :  { %132 = vmatmul.mubr.msk.bf16.vlgmr.msra.gmra.mxu0 %vm43_vm1, %v19_v5 }
  0xc9   :  { %v81_v7 = vpop.f32.mrf.mxu0 }
  0xca   :  { %v82_v8 = vadd.f32 %v116_v6, %v81_v7 }
  0xcb   :  { %v133_v9 = vpop.f32.mrf.mxu0 }
  0xcc   :  { %v122_v10 = vpack.c.bf16 %v82_v8, %v82_v8 }
  0xcd   :  { %v84_v11 = vpop.f32.mrf.mxu0 }
  0xce   :  { %97 = vst.msk [vmem:[%s198_s3] sm:$0xf] %vm96_vm2, %v122_v10  ;;  %v85_v12 = vadd.f32 %v116_v6, %v84_v11  ;;  %99 = vrot.lane.b32.xlu0 %v122_v10, %s142_s0 }
  0xcf   :  { %v134_v13 = vpop.f32.mrf.mxu0 }
  0xd0   :  { %v123_v14 = vpack.c.bf16 %v85_v12, %v85_v12 }
  0xd2   :  { %98 = vst.msk [vmem:[%s198_s3 + $0x4] sm:$0xf] %vm96_vm2, %v123_v14  ;;  %101 = vrot.lane.b32.xlu0 %v123_v14, %s142_s0 }
 0x140   :  { %v100_v15 = vpop.permute.xlu0 %99 }
 0x141   :  { %106 = vst.msk [vmem:[%s199_s4] sm:$0xf] %vm105_vm3, %v100_v15 }
 0x144   :  { %v102_v16 = vpop.permute.xlu0 %101 }
 0x145   :  { %107 = vst.msk [vmem:[%s199_s4 + $0x4] sm:$0xf] %vm105_vm3, %v102_v16 }

// kernel: multihead_attention.4
= control target key start
LH: loop header
LB: loop body
LE: loop exit
PB: predicated region body
PF: predicated region fallthrough
CT: control target
= control target key end

     0   :  { %s955_s9 = smov 0   ;;  %s957_s10 = smov 0   ;;  %s1059_s0 = inlined_call_operand.vmem [shape: bf16[2,8,32], index: 0, kind: input, shape index: {}]   ;;  %s1060_s1 = inlined_call_operand.vmem [shape: bf16[2,8,64], index: 1, kind: input, shape index: {}]   ;;  %s1061_s2 = inlined_call_operand.vmem [shape: bf16[2,4,8,8], index: 2, kind: output, shape index: {}]  }
   0x1   :  { %s959_s11 = smov 0  }
   0x2 LB: > { %s31_s12 = sadd.s32 1, %s925_s10  ;;  %p780_p0 = scmp.ge.s32.totalorder %s929_s11, 1  ;;  %s929_s11 = sphi %s959_s11, %s12_s11   ;;  %s925_s10 = sphi %s957_s10, %s1063_s10   ;;  %s921_s9 = sphi %s955_s9, %s1062_s9  }
   0x3   : > { %p33_p1 = scmp.ge.s32.totalorder %s31_s12, 2  ;;  %p151_p2 = scmp.lt.s32.totalorder %s929_s11, 3 }
   0x5   : > { %s1065_s12 = smov (%p33_p1, %s31_s12), 0  ;;  %p152_p3 = pnand %p780_p0, %p151_p2 }
   0x6   : > { %p185_p4 = scmp.lt.s32.totalorder (!%p152_p3), %s921_s9, 1  ;;  %s933_s20 = smov (!%p152_p3), 120  }
   0x7   : > { %155 = sbr.rel (%p152_p3) target bundleno = 605 (0x25d), region = 28  ;;  %s934_s21 = smov (!%p152_p3), 112  }
   0x8   : > { %s935_s22 = smov (!%p152_p3), 104   ;;  %s936_s23 = smov (!%p152_p3), 88  }
   0x9   : > { %s937_s24 = smov (!%p152_p3), 96   ;;  %s938_s25 = smov (!%p152_p3), 72  }
   0xa   : > { %s939_s26 = smov (!%p152_p3), 80  }
   0xc   : > { %vm212_vm0 = vcmask 64512   ;;  %v931_v0 = vmov 0.0   ;;  %s1067_s9 = smov (!%p185_p4, %s921_s9), 1  ;;  %vm932_vm1 = vmmov 0   ;;  %vm456_vm2 = vcmask 1043456  }
   0xd   : > { %814 = vmatprep.subr.bf16.mxu0 %v931_v0  ;;  %213 = vst.msk [vmem:[#allocation2] sm:$0xff] %vm212_vm0, %v931_v0  ;;  %214 = vst.msk [vmem:[#allocation2 + $0x8] sm:$0xff] %vm212_vm0, %v931_v0  ;;  %820 = vmatprep.subr.bf16.mxu1 %v931_v0  ;;  %s781_s13 = sshll.u32 %s1067_s9, 2  ;;  %s797_s27 = sshll.u32 %s1067_s9, 4  ;;  %vm673_vm3 = vcmask 60416  }
   0xe   : > { %215 = vst.msk [vmem:[#allocation2 + $0x10] sm:$0xff] %vm212_vm0, %v931_v0  ;;  %216 = vst.msk [vmem:[#allocation2 + $0x18] sm:$0xff] %vm212_vm0, %v931_v0  ;;  %816 = vmatprep.mubr.msk.bf16.mxu0 %vm932_vm1, %v931_v0  ;;  %822 = vmatprep.mubr.msk.bf16.mxu1 %vm932_vm1, %v931_v0  ;;  %s198_s16 = scalar_lea.vmem %s1060_s1, %s781_s13  ;;  %s191_s19 = scalar_lea.vmem %s1059_s0, %s781_s13 }
   0xf   : > { %v218_v1 = vld [vmem:[%s198_s16] sm:$0xf]  ;;  %s206_s30 = scalar_lea.vmem %s1061_s2, %s797_s27 }
  0x10   : > { %v787_v2 = vcombine.low %v218_v1, %v218_v1  ;;  %v217_v3 = vld [vmem:[%s191_s19] sm:$0xf]  ;;  %v224_v4 = vsel %vm212_vm0, %v218_v1, 0 }
  0x11   : > { %815 = vmatpush3.bf16.xpose.msra.mxu0 %v224_v4  ;;  %v786_v5 = vcombine.low %v217_v3, %v217_v3 }
  0x12   : > { %274 = vrot.lane.b32.xlu0 %v787_v2, %s933_s20  ;;  %324 = vrot.lane.b32.xlu1 %v787_v2, %s934_s21 }
  0x13   : > { %826 = vmatprep.subr.bf16.mxu0 %v931_v0 }
  0x16   : > { %269 = vrot.lane.b32.xlu0 %v786_v5, %s933_s20  ;;  %374 = vrot.lane.b32.xlu1 %v787_v2, %s935_s22 }
  0x18   : > { %817 = vmatmul.mubr.msk.bf16.vlgmr.msra.gmra.mxu0 %vm212_vm0, %v217_v3 }
  0x19   : > { %828 = vmatprep.mubr.msk.bf16.mxu0 %vm932_vm1, %v931_v0 }
  0x1a   : > { %322 = vrot.lane.b32.xlu0 %v786_v5, %s934_s21  ;;  %372 = vrot.lane.b32.xlu1 %v786_v5, %s935_s22 }
  0x1e   : > { %502 = vrot.lane.b32.xlu1 %v787_v2, %s936_s23  ;;  %451 = vrot.lane.b32.xlu0 %v787_v2, %s937_s24 }
  0x22   : > { %602 = vrot.lane.b32.xlu1 %v787_v2, %s938_s25  ;;  %552 = vrot.lane.b32.xlu0 %v787_v2, %s939_s26 }
  0x84   : > { %v275_v6 = vpop.permute.xlu0 %274  ;;  %v325_v7 = vpop.permute.xlu1 %324 }
  0x85   : > { %v280_v8 = vsel %vm212_vm0, %v275_v6, 0  ;;  %v330_v9 = vsel %vm212_vm0, %v325_v7, 0 }
  0x86   : > { %821 = vmatpush3.bf16.xpose.msra.mxu1 %v280_v8  ;;  %827 = vmatpush3.bf16.xpose.msra.mxu0 %v330_v9 }
  0x87   : > { %832 = vmatprep.subr.bf16.mxu1 %v931_v0  ;;  %838 = vmatprep.subr.bf16.mxu0 %v931_v0 }
  0x88   : > { %v270_v10 = vpop.permute.xlu0 %269  ;;  %v375_v11 = vpop.permute.xlu1 %374 }
  0x89   : > { %v380_v12 = vsel %vm212_vm0, %v375_v11, 0  ;;  %v650_v11 = vld [vmem:[#allocation2] sm:$0xff] }
  0x8c   : > { %v323_v13 = vpop.permute.xlu0 %322  ;;  %v373_v14 = vpop.permute.xlu1 %372 }
  0x8d   : > { %823 = vmatmul.mubr.msk.bf16.vlgmr.msra.gmra.mxu1 %vm212_vm0, %v270_v10  ;;  %829 = vmatmul.mubr.msk.bf16.vlgmr.msra.gmra.mxu0 %vm212_vm0, %v323_v13 }
  0x8e   : > { %833 = vmatpush3.bf16.xpose.msra.mxu1 %v380_v12  ;;  %834 = vmatprep.mubr.msk.bf16.mxu1 %vm932_vm1, %v931_v0  ;;  %v651_v12 = vld [vmem:[#allocation2 + $0x8] sm:$0xff] }
  0x8f   : > { %844 = vmatprep.subr.bf16.mxu1 %v931_v0  ;;  %840 = vmatprep.mubr.msk.bf16.mxu0 %vm932_vm1, %v931_v0 }
  0x90   : > { %v503_v19 = vpop.permute.xlu1 %502  ;;  %v452_v20 = vpop.permute.xlu0 %451 }
  0x91   : > { %v508_v21 = vsel %vm456_vm2, %v503_v19, 0  ;;  %v458_v22 = vsel %vm456_vm2, %v452_v20, 0 }
  0x92   : > { %839 = vmatpush3.bf16.msra.mxu0 %v458_v22  ;;  %v652_v22 = vld [vmem:[#allocation2 + $0x10] sm:$0xff] }
  0x93   : > { %850 = vmatprep.subr.bf16.mxu0 %v931_v0 }
  0x94   : > { %v603_v62 = vpop.permute.xlu1 %602  ;;  %v553_v63 = vpop.permute.xlu0 %552 }
  0x95   : > { %835 = vmatmul.mubr.msk.bf16.vlgmr.msra.gmra.mxu1 %vm212_vm0, %v373_v14  ;;  %v608_v3 = vsel %vm456_vm2, %v603_v62, 0  ;;  %v558_v4 = vsel %vm456_vm2, %v553_v63, 0 }
  0x96   : > { %846 = vmatprep.mubr.msk.bf16.mxu1 %vm932_vm1, %v931_v0  ;;  %845 = vmatpush3.bf16.msra.mxu1 %v508_v21 }
  0x97   : > { %856 = vmatprep.subr.bf16.mxu1 %v931_v0 }
  0xd8   : > { %v260_v15 = vpop.f32.mrf.mxu0 }
  0xd9   : > { %v422_v31 = vsel %vm212_vm0, %v260_v15, -inf }
  0xda   : > { %v818_v16 = vpop.f32.mrf.mxu0 }
  0xdc   : > { %v263_v17 = vpop.f32.mrf.mxu0 }
  0xde   : > { %v819_v18 = vpop.f32.mrf.mxu0 }
 0x14d   : > { %v316_v23 = vpop.f32.mrf.mxu1  ;;  %v366_v24 = vpop.f32.mrf.mxu0 }
 0x14e   : > { %v423_v32 = vsel %vm212_vm0, %v316_v23, -inf  ;;  %v424_v33 = vsel %vm212_vm0, %v366_v24, -inf }
 0x14f   : > { %v824_v25 = vpop.f32.mrf.mxu1  ;;  %v830_v26 = vpop.f32.mrf.mxu0  ;;  %v426_v36 = vmax.f32 %v422_v31, %v423_v32 }
 0x151   : > { %v319_v27 = vpop.f32.mrf.mxu1  ;;  %v369_v28 = vpop.f32.mrf.mxu0 }
 0x153   : > { %v825_v29 = vpop.f32.mrf.mxu1  ;;  %v831_v30 = vpop.f32.mrf.mxu0 }
 0x155   : > { %v416_v34 = vpop.f32.mrf.mxu1 }
 0x156   : > { %v425_v35 = vsel %vm212_vm0, %v416_v34, -inf }
 0x157   : > { %v427_v37 = vmax.f32 %v424_v33, %v425_v35  ;;  %v836_v38 = vpop.f32.mrf.mxu1 }
 0x159   : > { %v428_v39 = vmax.f32 %v426_v36, %v427_v37  ;;  %v419_v40 = vpop.f32.mrf.mxu1 }
 0x15b   : > { %v429_v41 = vsub.f32 %v260_v15, %v428_v39  ;;  %v430_v42 = vsub.f32 %v316_v23, %v428_v39  ;;  %v431_v43 = vsub.f32 %v366_v24, %v428_v39  ;;  %v432_v44 = vsub.f32 %v416_v34, %v428_v39  ;;  %v837_v45 = vpop.f32.mrf.mxu1  ;;  %v653_v23 = vld [vmem:[#allocation2 + $0x18] sm:$0xff] }
 0x15d   : > { %v433_v46 = vmul.f32 1.442695, %v429_v41  ;;  %v435_v47 = vmul.f32 1.442695, %v430_v42  ;;  %v437_v48 = vmul.f32 1.442695, %v431_v43 }
 0x15e   : > { %v439_v49 = vmul.f32 1.442695, %v432_v44 }
 0x15f   : > { %897 = vpow2.f32 %v433_v46 }
 0x160   : > { %899 = vpow2.f32 %v435_v47 }
 0x161   : > { %901 = vpow2.f32 %v437_v48 }
 0x162   : > { %903 = vpow2.f32 %v439_v49 }
 0x16c   : > { %v898_v50 = vpop.eup %897 }
 0x16d   : > { %v900_v51 = vpop.eup %899  ;;  %v441_v52 = vsel %vm212_vm0, %v898_v50, 0.0 }
 0x16e   : > { %v902_v53 = vpop.eup %901  ;;  %v442_v54 = vsel %vm212_vm0, %v900_v51, 0.0 }
 0x16f   : > { %v904_v55 = vpop.eup %903  ;;  %v443_v56 = vadd.f32 %v442_v54, %v441_v52  ;;  %v444_v57 = vsel %vm212_vm0, %v902_v53, 0.0 }
 0x170   : > { %v446_v59 = vsel %vm212_vm0, %v904_v55, 0.0 }
 0x171   : > { %v445_v58 = vadd.f32 %v444_v57, %v443_v56 }
 0x173   : > { %v447_v60 = vadd.f32 %v446_v59, %v445_v58 }
 0x175   : > { %905 = vrcp.f32 %v447_v60 }
 0x182   : > { %v906_v61 = vpop.eup %905 }
 0x183   : > { %v449_v1 = vmul.f32 %v906_v61, %v898_v50  ;;  %v500_v2 = vmul.f32 %v906_v61, %v900_v51  ;;  %v550_v7 = vmul.f32 %v906_v61, %v902_v53  ;;  %v600_v8 = vmul.f32 %v906_v61, %v904_v55 }
 0x185   : > { %v450_v5 = vpack.c.bf16 %v449_v1, %v449_v1  ;;  %v501_v6 = vpack.c.bf16 %v500_v2, %v500_v2  ;;  %v551_v9 = vpack.c.bf16 %v550_v7, %v550_v7  ;;  %v601_v10 = vpack.c.bf16 %v600_v8, %v600_v8 }
 0x187   : > { %841 = vmatmul.mubr.msk.bf16.vlgmr.msra.gmra.mxu0 %vm212_vm0, %v450_v5  ;;  %847 = vmatmul.mubr.msk.bf16.vlgmr.msra.gmra.mxu1 %vm212_vm0, %v501_v6 }
 0x188   : > { %851 = vmatpush3.bf16.msra.mxu0 %v558_v4  ;;  %857 = vmatpush3.bf16.msra.mxu1 %v608_v3 }
 0x189   : > { %852 = vmatprep.mubr.msk.bf16.mxu0 %vm932_vm1, %v931_v0  ;;  %858 = vmatprep.mubr.msk.bf16.mxu1 %vm932_vm1, %v931_v0 }
 0x18f   : > { %853 = vmatmul.mubr.msk.bf16.vlgmr.msra.gmra.mxu0 %vm212_vm0, %v551_v9  ;;  %859 = vmatmul.mubr.msk.bf16.vlgmr.msra.gmra.mxu1 %vm212_vm0, %v601_v10 }
 0x247   : > { %v494_v13 = vpop.f32.mrf.mxu0  ;;  %v544_v14 = vpop.f32.mrf.mxu1 }
 0x248   : > { %v654_v15 = vadd.f32 %v650_v11, %v494_v13  ;;  %v655_v16 = vadd.f32 %v651_v12, %v544_v14 }
 0x249   : > { %v842_v17 = vpop.f32.mrf.mxu0  ;;  %v848_v18 = vpop.f32.mrf.mxu1 }
 0x24a   : > { %658 = vst.msk [vmem:[#allocation2] sm:$0xff] %vm212_vm0, %v654_v15  ;;  %659 = vst.msk [vmem:[#allocation2 + $0x8] sm:$0xff] %vm212_vm0, %v655_v16 }
 0x24b   : > { %v497_v0 = vpop.f32.mrf.mxu0  ;;  %v547_v19 = vpop.f32.mrf.mxu1 }
 0x24d   : > { %v843_v20 = vpop.f32.mrf.mxu0  ;;  %v849_v21 = vpop.f32.mrf.mxu1 }
 0x24f   : > { %v594_v24 = vpop.f32.mrf.mxu0  ;;  %v644_v25 = vpop.f32.mrf.mxu1 }
 0x250   : > { %v656_v26 = vadd.f32 %v652_v22, %v594_v24  ;;  %v657_v27 = vadd.f32 %v653_v23, %v644_v25 }
 0x251   : > { %v665_v28 = vld [vmem:[#allocation2] sm:$0xff]  ;;  %v666_v29 = vld [vmem:[#allocation2 + $0x8] sm:$0xff]  ;;  %v854_v30 = vpop.f32.mrf.mxu0  ;;  %v860_v31 = vpop.f32.mrf.mxu1 }
 0x252   : > { %v669_v32 = vpack.c.bf16 %v665_v28, %v665_v28  ;;  %v670_v33 = vpack.c.bf16 %v666_v29, %v666_v29  ;;  %660 = vst.msk [vmem:[#allocation2 + $0x10] sm:$0xff] %vm212_vm0, %v656_v26  ;;  %661 = vst.msk [vmem:[#allocation2 + $0x18] sm:$0xff] %vm212_vm0, %v657_v27 }
 0x253   : > { %v597_v34 = vpop.f32.mrf.mxu0  ;;  %v647_v35 = vpop.f32.mrf.mxu1 }
 0x254   : > { %674 = vst.msk [vmem:[%s206_s30] sm:$0xf] %vm673_vm3, %v669_v32  ;;  %675 = vst.msk [vmem:[%s206_s30 + $0x4] sm:$0xf] %vm673_vm3, %v670_v33 }
 0x255   : > { %v855_v36 = vpop.f32.mrf.mxu0  ;;  %v861_v37 = vpop.f32.mrf.mxu1 }
 0x259   : > { %v667_v38 = vld [vmem:[#allocation2 + $0x10] sm:$0xff]  ;;  %v668_v39 = vld [vmem:[#allocation2 + $0x18] sm:$0xff] }
 0x25a   : > { %v671_v40 = vpack.c.bf16 %v667_v38, %v667_v38  ;;  %v672_v41 = vpack.c.bf16 %v668_v39, %v668_v39 }
 0x25c   : > { %676 = vst.msk [vmem:[%s206_s30 + $0x8] sm:$0xf] %vm673_vm3, %v671_v40  ;;  %677 = vst.msk [vmem:[%s206_s30 + $0xc] sm:$0xf] %vm673_vm3, %v672_v41 }
 0x25d PF: > { %s12_s11 = sadd.s32 1, %s929_s11   ;;  %s1062_s9 = smov %s925_s10 }
 0x25e   : > { %p9_p5 = scmp.ge.s32.totalorder %s12_s11, 4   ;;  %s1063_s10 = smov %s1065_s12 }
 0x260   :  { %11 = sbr.rel (!%p9_p5) target bundleno = 2 (0x2), region = 69 }

</bundles_post_ra>
